<compile_context>
chip_gen: v7x
topology: tpu7x:2x2x1
jax: 0.10.0
libtpu: 0.0.40
codegen_flags: <defaults>
</compile_context>

<pallas_src>
import functools

import jax
import jax.numpy as jnp
from jax import lax
from jax.experimental import pallas as pl
from jax.experimental.pallas import tpu as pltpu

LANE = 128
DEFAULT_TM = 512                 # row block: f32 accumulator / output tile height
DEFAULT_TK = 2048                # adjacency contraction block (streams bf16)
FUSED_MAX = 512                  # n_pad <= this -> single fused kernel
RESIDENT_FEATURE_BYTES = 24 * 1024 * 1024  # X / h1 VMEM-resident budget (incl. 2x buf)


def _round_up(x, m):
    return (x + m - 1) // m * m


def _pad2(a, rows, cols, dtype=jnp.float32):
    a = jnp.asarray(a, jnp.float32)
    return jnp.pad(a, ((0, rows - a.shape[0]), (0, cols - a.shape[1]))).astype(dtype)


# ----------------------------------------------------------------------------
# Fused small-graph kernel: both GCN layers + cosine head in one VMEM-resident pass.
# ----------------------------------------------------------------------------
def fused_gcn_cosine_kernel(adj_ref, x_ref, w1_ref, b1_ref, w2_ref, b2_ref,
                            cls_t_ref, inv_e_ref, out_ref):
    adj = adj_ref[...]                                                  # bf16 [Np, Np]
    ax = jnp.dot(adj, x_ref[...], preferred_element_type=jnp.float32)  # [Np, Fp] f32
    h1 = jnp.maximum(
        jnp.dot(ax, w1_ref[...], preferred_element_type=jnp.float32) + b1_ref[...],
        0.0)
    ah = jnp.dot(adj, h1.astype(jnp.bfloat16),
                 preferred_element_type=jnp.float32)                    # [Np, Hp]
    h2 = jnp.dot(ah, w2_ref[...], preferred_element_type=jnp.float32) + b2_ref[...]
    dots = jnp.dot(h2, cls_t_ref[...], preferred_element_type=jnp.float32)
    inv_xn = lax.rsqrt(jnp.maximum(jnp.sum(h2 * h2, axis=-1, keepdims=True), 1e-16))
    out_ref[...] = dots * inv_xn * inv_e_ref[...]


# ----------------------------------------------------------------------------
# Tiled kernel 1: h1 = relu((A @ X) @ W1 + b1)   (== relu(A @ (X @ W1) + b1))
# ----------------------------------------------------------------------------
def gcn_layer1_kernel(adj_ref, x_ref, w1_ref, b1_ref, h1_ref, acc_ref,
                      *, tk, x_resident):
    k = pl.program_id(1)

    @pl.when(k == 0)
    def _():
        acc_ref[...] = jnp.zeros_like(acc_ref)

    if x_resident:
        # X lives fully in VMEM (constant block index -> DMA'd once); slice the
        # k-th TK rows. Start is a multiple of tk (itself a multiple of 128).
        x_blk = x_ref[pl.ds(pl.multiple_of(k * tk, tk), tk), :]
    else:
        x_blk = x_ref[...]

    # bf16 x bf16 -> f32 accumulate: the dominant, N^2-scaled MXU/HBM work.
    acc_ref[...] += jnp.dot(adj_ref[...], x_blk,
                            preferred_element_type=jnp.float32)

    @pl.when(k == pl.num_programs(1) - 1)
    def _():
        h = jnp.dot(acc_ref[...], w1_ref[...], preferred_element_type=jnp.float32)
        h1_ref[...] = jnp.maximum(h + b1_ref[...], 0.0).astype(h1_ref.dtype)


# ----------------------------------------------------------------------------
# Tiled kernel 2: h2 = (A @ H1) @ W2 + b2 ; out = <h2,e> * rsqrt(|h2|^2) * (1/|e|)
# ----------------------------------------------------------------------------
def gcn_layer2_cosine_kernel(adj_ref, h1_ref, w2_ref, b2_ref, cls_t_ref,
                             inv_e_ref, out_ref, acc_ref, *, tk, h_resident):
    k = pl.program_id(1)

    @pl.when(k == 0)
    def _():
        acc_ref[...] = jnp.zeros_like(acc_ref)

    if h_resident:
        h_blk = h1_ref[pl.ds(pl.multiple_of(k * tk, tk), tk), :]
    else:
        h_blk = h1_ref[...]

    acc_ref[...] += jnp.dot(adj_ref[...], h_blk,
                            preferred_element_type=jnp.float32)

    @pl.when(k == pl.num_programs(1) - 1)
    def _():
        h2 = jnp.dot(acc_ref[...], w2_ref[...],
                     preferred_element_type=jnp.float32) + b2_ref[...]
        dots = jnp.dot(h2, cls_t_ref[...], preferred_element_type=jnp.float32)
        # Per-row rsqrt (tm EUP ops) instead of a [tm, Cp] reciprocal (tm*Cp EUP ops).
        inv_xn = lax.rsqrt(jnp.maximum(jnp.sum(h2 * h2, axis=-1, keepdims=True),
                                       1e-16))
        out_ref[...] = dots * inv_xn * inv_e_ref[...]


# ----------------------------------------------------------------------------
# Planning + preprocessing (hoistable out of the per-call hot path).
# ----------------------------------------------------------------------------
def _choose_tiles(n128, max_tm, max_tk):
    tk = min(max_tk, n128)
    n_pad = _round_up(n128, tk)
    tm = min(max_tm, n_pad)
    while tm > 128 and n_pad % tm != 0:
        tm //= 2
    if n_pad % tm != 0:
        tm = 128  # n_pad is always a multiple of 128
    # v7x megacore: keep >= 2 row blocks so both TensorCores get work.
    if n_pad // tm < 2 and tm > 128:
        tm //= 2
    return tm, tk, n_pad


def plan(num_nodes, *, max_tm=DEFAULT_TM, max_tk=DEFAULT_TK, fused_max=FUSED_MAX):
    n128 = _round_up(num_nodes, LANE)
    if n128 <= fused_max:
        return {"fused": True, "n_pad": n128, "tm": n128, "tk": n128}
    tm, tk, n_pad = _choose_tiles(n128, max_tm, max_tk)
    return {"fused": False, "n_pad": n_pad, "tm": tm, "tk": tk}


def preprocess_adjacency(adj, n_pad):
    """Pad + bf16-cast the dense GCN adjacency ONCE.

    Hoist this out of the per-call path when the graph is reused: the pad/cast
    otherwise re-materializes ~6*N^2 HBM bytes every call (more than both GCN
    layers stream combined)."""
    return _pad2(adj, n_pad, n_pad, jnp.bfloat16)


# ----------------------------------------------------------------------------
# Head implementation (takes the pre-padded bf16 adjacency).
# ----------------------------------------------------------------------------
@functools.partial(jax.jit,
                   static_argnames=("tm", "tk", "fused", "resident_bytes"))
def _shot_nc_head_impl(x, adj_p, w1, b1, w2, b2, cls_emb, *,
                       tm, tk, fused, resident_bytes=RESIDENT_FEATURE_BYTES):
    n_pad = adj_p.shape[0]
    n, in_dim = x.shape
    hidden = w1.shape[1]
    cls_dim = w2.shape[1]
    num_cls = cls_emb.shape[0]

    f_pad = _round_up(in_dim, LANE)
    h_pad = _round_up(hidden, LANE)
    d_pad = _round_up(cls_dim, LANE)
    c_pad = _round_up(num_cls, LANE)

    # bf16 for the big MXU/HBM operands; small params stay f32 (finalize-only).
    x_p = _pad2(x, n_pad, f_pad, jnp.bfloat16)
    w1_p = _pad2(w1.reshape(in_dim, hidden), f_pad, h_pad)
    b1_p = _pad2(b1.reshape(1, -1), 1, h_pad)
    w2_p = _pad2(w2.reshape(hidden, cls_dim), h_pad, d_pad)
    b2_p = _pad2(b2.reshape(1, -1), 1, d_pad)
    cls_t_p = _pad2(jnp.asarray(cls_emb, jnp.float32).T, d_pad, c_pad)
    # 1 / max(||e_c||, 1e-8) hoisted to the wrapper (no in-kernel EUP divide on it).
    e_norm = jnp.sqrt(jnp.sum(jnp.asarray(cls_emb, jnp.float32) ** 2, axis=-1))
    inv_e = 1.0 / jnp.maximum(e_norm, 1e-8)
    inv_e_p = jnp.pad(inv_e, (0, c_pad - num_cls)).reshape(1, c_pad)

    if fused:
        # Single un-gridded kernel: h1 never leaves VMEM, one launch.
        out_p = pl.pallas_call(
            fused_gcn_cosine_kernel,
            out_shape=jax.ShapeDtypeStruct((n_pad, c_pad), jnp.float32),
        )(adj_p, x_p, w1_p, b1_p, w2_p, b2_p, cls_t_p, inv_e_p)
        return out_p[:n, :num_cls]

    ni = n_pad // tm
    nk = n_pad // tk
    cparams = pltpu.CompilerParams(
        dimension_semantics=("parallel", "arbitrary"),
        vmem_limit_bytes=48 * 1024 * 1024)

    # VMEM-resident feature operands when they fit (x2 for possible double-buffer).
    x_resident = n_pad * f_pad * 2 * 2 <= resident_bytes
    h_resident = n_pad * h_pad * 2 * 2 <= resident_bytes
    x_spec = (pl.BlockSpec((n_pad, f_pad), lambda i, k: (0, 0)) if x_resident
              else pl.BlockSpec((tk, f_pad), lambda i, k: (k, 0)))
    h1_spec = (pl.BlockSpec((n_pad, h_pad), lambda i, k: (0, 0)) if h_resident
               else pl.BlockSpec((tk, h_pad), lambda i, k: (k, 0)))

    h1 = pl.pallas_call(
        functools.partial(gcn_layer1_kernel, tk=tk, x_resident=x_resident),
        out_shape=jax.ShapeDtypeStruct((n_pad, h_pad), jnp.bfloat16),
        grid_spec=pltpu.PrefetchScalarGridSpec(
            num_scalar_prefetch=0,
            grid=(ni, nk),
            in_specs=[
                pl.BlockSpec((tm, tk), lambda i, k: (i, k)),        # adj (streamed)
                x_spec,                                             # x
                pl.BlockSpec((f_pad, h_pad), lambda i, k: (0, 0)),  # W1
                pl.BlockSpec((1, h_pad), lambda i, k: (0, 0)),      # b1
            ],
            out_specs=pl.BlockSpec((tm, h_pad), lambda i, k: (i, 0)),
            scratch_shapes=[pltpu.VMEM((tm, f_pad), jnp.float32)]),
        compiler_params=cparams,
    )(adj_p, x_p, w1_p, b1_p)

    out_p = pl.pallas_call(
        functools.partial(gcn_layer2_cosine_kernel, tk=tk, h_resident=h_resident),
        out_shape=jax.ShapeDtypeStruct((n_pad, c_pad), jnp.float32),
        grid_spec=pltpu.PrefetchScalarGridSpec(
            num_scalar_prefetch=0,
            grid=(ni, nk),
            in_specs=[
                pl.BlockSpec((tm, tk), lambda i, k: (i, k)),        # adj (streamed)
                h1_spec,                                            # h1
                pl.BlockSpec((h_pad, d_pad), lambda i, k: (0, 0)),  # W2
                pl.BlockSpec((1, d_pad), lambda i, k: (0, 0)),      # b2
                pl.BlockSpec((d_pad, c_pad), lambda i, k: (0, 0)),  # cls^T
                pl.BlockSpec((1, c_pad), lambda i, k: (0, 0)),      # 1/||e_c||
            ],
            out_specs=pl.BlockSpec((tm, c_pad), lambda i, k: (i, 0)),
            scratch_shapes=[pltpu.VMEM((tm, h_pad), jnp.float32)]),
        compiler_params=cparams,
    )(adj_p, h1, w2_p, b2_p, cls_t_p, inv_e_p)

    return out_p[:n, :num_cls]


def shot_nc_head(x, adj, w1, b1, w2, b2, cls_emb, *,
                 max_tm=DEFAULT_TM, max_tk=DEFAULT_TK, fused_max=FUSED_MAX,
                 resident_bytes=RESIDENT_FEATURE_BYTES):
    """One-shot convenience wrapper. For repeated calls on a fixed graph, hoist:
        p = plan(N); adj_p = preprocess_adjacency(adj, p['n_pad'])
        out = _shot_nc_head_impl(x, adj_p, ..., tm=p['tm'], tk=p['tk'], fused=p['fused'])
    """
    p = plan(x.shape[0], max_tm=max_tm, max_tk=max_tk, fused_max=fused_max)
    adj_p = preprocess_adjacency(adj, p["n_pad"])
    return _shot_nc_head_impl(x, adj_p, w1, b1, w2, b2, cls_emb,
                              tm=p["tm"], tk=p["tk"], fused=p["fused"],
                              resident_bytes=resident_bytes)


# ----------------------------------------------------------------------------
# Glue: dense GCN adjacency (PyG GCNConv semantics) and plain-JAX reference.
# ----------------------------------------------------------------------------
def build_gcn_adj(edge_index, num_nodes):
    """Dense D^{-1/2}(A + I)D^{-1/2} as used by PyG GCNConv (source -> target)."""
    src, dst = edge_index
    loop = jnp.arange(num_nodes)
    src = jnp.concatenate([src, loop])
    dst = jnp.concatenate([dst, loop])
    a = jnp.zeros((num_nodes, num_nodes), jnp.float32).at[dst, src].set(1.0)
    deg = a.sum(axis=1)
    d_inv_sqrt = jnp.where(deg > 0, 1.0 / jnp.sqrt(deg), 0.0)
    return d_inv_sqrt[:, None] * a * d_inv_sqrt[None, :]


def reference(x, adj, w1, b1, w2, b2, cls_emb):
    h = jnp.maximum(adj @ (x @ w1) + b1[None, :], 0.0)
    h = adj @ (h @ w2) + b2[None, :]
    xn = jnp.linalg.norm(h, axis=-1, keepdims=True)
    en = jnp.linalg.norm(cls_emb, axis=-1, keepdims=True).T
    return (h @ cls_emb.T) / jnp.maximum(xn * en, 1e-8)


if __name__ == "__main__":
    key = jax.random.PRNGKey(0)
    ks = jax.random.split(key, 10)

    # ---------- Test 1: module-sized demo (fused small-graph fast path) --------
    N = 16            # number of nodes (shots)
    d0 = 8            # data.x feature dim (Euclidean component)
    dh = 8            # hyperbolic embedding dim
    ds = 8            # spherical embedding dim
    in_dim = d0 + dh + ds
    hidden_dim = 32
    cls_dim = 16
    num_cls = 5

    x0 = jax.random.normal(ks[0], (N, d0), jnp.float32)

    # synthetic pretrained_model outputs + manifold logmap0 (plain-JAX glue)
    wh = jax.random.normal(ks[1], (d0, dh), jnp.float32) / jnp.sqrt(d0)
    ws = jax.random.normal(ks[2], (d0, ds), jnp.float32) / jnp.sqrt(d0)
    z = x0 @ wh
    y_h = 0.5 * z / (1.0 + jnp.linalg.norm(z, axis=-1, keepdims=True))  # Poincare pt
    y_s = x0 @ ws                                                        # stereographic
    nh = jnp.maximum(jnp.linalg.norm(y_h, axis=-1, keepdims=True), 1e-12)
    x_h = jnp.arctanh(jnp.minimum(nh, 1.0 - 1e-6)) * y_h / nh            # logmap0 (H)
    nsp = jnp.maximum(jnp.linalg.norm(y_s, axis=-1, keepdims=True), 1e-12)
    x_s = jnp.arctan(nsp) * y_s / nsp                                    # logmap0 (S)
    x = jnp.concatenate([x0, x_h, x_s], axis=-1)                         # [N, in_dim]

    # graph: directed ring in both directions
    src = jnp.arange(N)
    dst = (src + 1) % N
    edge_index = jnp.stack([jnp.concatenate([src, dst]),
                            jnp.concatenate([dst, src])], axis=0)
    adj = build_gcn_adj(edge_index, N)

    def glorot(k, shape):
        lim = jnp.sqrt(6.0 / (shape[0] + shape[1]))
        return jax.random.uniform(k, shape, jnp.float32, -lim, lim)

    w1 = glorot(ks[3], (in_dim, hidden_dim))
    b1 = 0.1 * jax.random.normal(ks[4], (hidden_dim,), jnp.float32)
    w2 = glorot(ks[5], (hidden_dim, cls_dim))
    b2 = 0.1 * jax.random.normal(ks[6], (cls_dim,), jnp.float32)
    cls_embeddings = jax.random.normal(ks[7], (num_cls, cls_dim), jnp.float32)

    out = shot_nc_head(x, adj, w1, b1, w2, b2, cls_embeddings)
    jax.block_until_ready(out)
    assert out.shape == (N, num_cls)
    assert bool(jnp.all(jnp.isfinite(out)))
    ref = reference(x, adj, w1, b1, w2, b2, cls_embeddings)
    err1 = float(jnp.max(jnp.abs(out - ref)))
    assert err1 < 0.1, f"fused path: max abs error vs f32 reference too large: {err1}"

    # ---------- Test 2: tiled path, VMEM-resident features (grid i>1, k>1) -----
    N2 = 400
    x2 = jax.random.normal(ks[8], (N2, in_dim), jnp.float32)
    src2 = jnp.arange(N2)
    dst2 = (src2 + 1) % N2
    edge_index2 = jnp.stack([jnp.concatenate([src2, dst2]),
                             jnp.concatenate([dst2, src2])], axis=0)
    adj2 = build_gcn_adj(edge_index2, N2)
    ref2 = reference(x2, adj2, w1, b1, w2, b2, cls_embeddings)

    out2 = shot_nc_head(x2, adj2, w1, b1, w2, b2, cls_embeddings,
                        max_tm=128, max_tk=256, fused_max=0)
    jax.block_until_ready(out2)
    assert out2.shape == (N2, num_cls)
    err2 = float(jnp.max(jnp.abs(out2 - ref2)))
    assert err2 < 0.1, f"tiled resident path: max abs error too large: {err2}"

    # ---------- Test 3: tiled path, streamed features (residency disabled) -----
    out3 = shot_nc_head(x2, adj2, w1, b1, w2, b2, cls_embeddings,
                        max_tm=128, max_tk=256, fused_max=0, resident_bytes=0)
    jax.block_until_ready(out3)
    err3 = float(jnp.max(jnp.abs(out3 - ref2)))
    assert err3 < 0.1, f"tiled streamed path: max abs error too large: {err3}"

    print("KERNEL_OK")
</pallas_src>

<mosaic_0001>
module attributes {stable_mosaic.version = 11 : i64} {
  func.func @fused_gcn_cosine_kernel(%arg0: memref<128x128xbf16, #tpu.memory_space<vmem>>, %arg1: memref<128x128xbf16, #tpu.memory_space<vmem>>, %arg2: memref<128x128xf32, #tpu.memory_space<vmem>>, %arg3: memref<1x128xf32, #tpu.memory_space<vmem>>, %arg4: memref<128x128xf32, #tpu.memory_space<vmem>>, %arg5: memref<1x128xf32, #tpu.memory_space<vmem>>, %arg6: memref<128x128xf32, #tpu.memory_space<vmem>>, %arg7: memref<1x128xf32, #tpu.memory_space<vmem>>, %arg8: memref<128x128xf32, #tpu.memory_space<vmem>>) attributes {dimension_semantics = [], scalar_prefetch = 0 : i64, scratch_operands = 0 : i64, tpu.core_type = #tpu.core_type<tc>} {
    %c0 = arith.constant 0 : index
    %c0_0 = arith.constant 0 : index
    %0 = vector.load %arg0[%c0, %c0_0] : memref<128x128xbf16, #tpu.memory_space<vmem>>, vector<128x128xbf16>
    %c0_1 = arith.constant 0 : index
    %c0_2 = arith.constant 0 : index
    %1 = vector.load %arg1[%c0_1, %c0_2] : memref<128x128xbf16, #tpu.memory_space<vmem>>, vector<128x128xbf16>
    %cst = arith.constant dense<0.000000e+00> : vector<128x128xf32>
    %2 = tpu.matmul %0, %1, %cst {dimension_numbers = #tpu.dot_dimension_numbers<[1], [0], [0], [1], [0, 0, 1, 1], [], []>} : vector<128x128xbf16>, vector<128x128xbf16>, vector<128x128xf32> -> vector<128x128xf32>
    %c0_3 = arith.constant 0 : index
    %c0_4 = arith.constant 0 : index
    %3 = vector.load %arg2[%c0_3, %c0_4] : memref<128x128xf32, #tpu.memory_space<vmem>>, vector<128x128xf32>
    %cst_5 = arith.constant dense<0.000000e+00> : vector<128x128xf32>
    %4 = tpu.matmul %2, %3, %cst_5 {dimension_numbers = #tpu.dot_dimension_numbers<[1], [0], [0], [1], [0, 0, 1, 1], [], []>} : vector<128x128xf32>, vector<128x128xf32>, vector<128x128xf32> -> vector<128x128xf32>
    %c0_6 = arith.constant 0 : index
    %c0_7 = arith.constant 0 : index
    %5 = vector.load %arg3[%c0_6, %c0_7] : memref<1x128xf32, #tpu.memory_space<vmem>>, vector<1x128xf32>
    %6 = vector.broadcast %5 : vector<1x128xf32> to vector<128x128xf32>
    %7 = arith.addf %4, %6 : vector<128x128xf32>
    %cst_8 = arith.constant 0.000000e+00 : f32
    %8 = vector.broadcast %cst_8 : f32 to vector<128x128xf32>
    %9 = arith.maximumf %7, %8 : vector<128x128xf32>
    %10 = arith.truncf %9 : vector<128x128xf32> to vector<128x128xbf16>
    %cst_9 = arith.constant dense<0.000000e+00> : vector<128x128xf32>
    %11 = tpu.matmul %0, %10, %cst_9 {dimension_numbers = #tpu.dot_dimension_numbers<[1], [0], [0], [1], [0, 0, 1, 1], [], []>} : vector<128x128xbf16>, vector<128x128xbf16>, vector<128x128xf32> -> vector<128x128xf32>
    %c0_10 = arith.constant 0 : index
    %c0_11 = arith.constant 0 : index
    %12 = vector.load %arg4[%c0_10, %c0_11] : memref<128x128xf32, #tpu.memory_space<vmem>>, vector<128x128xf32>
    %cst_12 = arith.constant dense<0.000000e+00> : vector<128x128xf32>
    %13 = tpu.matmul %11, %12, %cst_12 {dimension_numbers = #tpu.dot_dimension_numbers<[1], [0], [0], [1], [0, 0, 1, 1], [], []>} : vector<128x128xf32>, vector<128x128xf32>, vector<128x128xf32> -> vector<128x128xf32>
    %c0_13 = arith.constant 0 : index
    %c0_14 = arith.constant 0 : index
    %14 = vector.load %arg5[%c0_13, %c0_14] : memref<1x128xf32, #tpu.memory_space<vmem>>, vector<1x128xf32>
    %15 = vector.broadcast %14 : vector<1x128xf32> to vector<128x128xf32>
    %16 = arith.addf %13, %15 : vector<128x128xf32>
    %c0_15 = arith.constant 0 : index
    %c0_16 = arith.constant 0 : index
    %17 = vector.load %arg6[%c0_15, %c0_16] : memref<128x128xf32, #tpu.memory_space<vmem>>, vector<128x128xf32>
    %cst_17 = arith.constant dense<0.000000e+00> : vector<128x128xf32>
    %18 = tpu.matmul %16, %17, %cst_17 {dimension_numbers = #tpu.dot_dimension_numbers<[1], [0], [0], [1], [0, 0, 1, 1], [], []>} : vector<128x128xf32>, vector<128x128xf32>, vector<128x128xf32> -> vector<128x128xf32>
    %19 = arith.mulf %16, %16 : vector<128x128xf32>
    %cst_18 = arith.constant dense<0.000000e+00> : vector<128xf32>
    %20 = vector.multi_reduction <add>, %19, %cst_18 [1] : vector<128x128xf32> to vector<128xf32>
    %21 = vector.shape_cast %20 : vector<128xf32> to vector<128x1xf32>
    %cst_19 = arith.constant 1.000000e-16 : f32
    %22 = vector.broadcast %cst_19 : f32 to vector<128x1xf32>
    %23 = arith.maximumf %21, %22 : vector<128x1xf32>
    %24 = math.rsqrt %23 : vector<128x1xf32>
    %25 = vector.broadcast %24 : vector<128x1xf32> to vector<128x128xf32>
    %26 = arith.mulf %18, %25 : vector<128x128xf32>
    %c0_20 = arith.constant 0 : index
    %c0_21 = arith.constant 0 : index
    %27 = vector.load %arg7[%c0_20, %c0_21] : memref<1x128xf32, #tpu.memory_space<vmem>>, vector<1x128xf32>
    %28 = vector.broadcast %27 : vector<1x128xf32> to vector<128x128xf32>
    %29 = arith.mulf %26, %28 : vector<128x128xf32>
    %c0_22 = arith.constant 0 : index
    %c0_23 = arith.constant 0 : index
    %30 = vector.load %arg8[%c0_22, %c0_23] : memref<128x128xf32, #tpu.memory_space<vmem>>, vector<128x128xf32>
    tpu.vector_store %arg8[%c0_22, %c0_23], %29 {strides = array<i32>} : memref<128x128xf32, #tpu.memory_space<vmem>>, vector<128x128xf32>,
    return
  }
}

</mosaic_0001>

<bundles_post_ra>
// kernel: _shot_nc_head_impl.1
= control target key start
LH: loop header
LB: loop body
LE: loop exit
PB: predicated region body
PF: predicated region fallthrough
CT: control target
= control target key end

     0   :  { %s1931_s1 = inlined_call_operand.vmem [shape: bf16[128,128], index: 1, kind: input, shape index: {}]   ;;  %s1932_s0 = inlined_call_operand.vmem [shape: bf16[128,128], index: 0, kind: input, shape index: {}]   ;;  %s1933_s2 = inlined_call_operand.vmem [shape: f32[128,128], index: 2, kind: input, shape index: {}]   ;;  %s1934_s4 = inlined_call_operand.vmem [shape: f32[128,128], index: 4, kind: input, shape index: {}]   ;;  %s1935_s3 = inlined_call_operand.vmem [shape: f32[1,128], index: 3, kind: input, shape index: {}]   ;;  %s1936_s6 = inlined_call_operand.vmem [shape: f32[128,128], index: 6, kind: input, shape index: {}]   ;;  %s1937_s5 = inlined_call_operand.vmem [shape: f32[1,128], index: 5, kind: input, shape index: {}]   ;;  %s1938_s7 = inlined_call_operand.vmem [shape: f32[1,128], index: 7, kind: input, shape index: {}]   ;;  %s1939_s8 = inlined_call_operand.vmem [shape: f32[128,128], index: 8, kind: output, shape index: {}]  }
   0x1   :  { %v1503_v0 = vld [vmem:[%s1931_s1] sm:$0xff]   ;;  %v1504_v1 = vld [vmem:[%s1931_s1 + $0x8] sm:$0xff]   ;;  %v1505_v2 = vld [vmem:[%s1931_s1 + $0x10] sm:$0xff]  }
   0x2   :  { %1159 = vmatprep.subr.bf16.mxu0 %v1503_v0  ;;  %v1506_v3 = vld [vmem:[%s1931_s1 + $0x18] sm:$0xff]   ;;  %v1611_v4 = vld [vmem:[%s1932_s0] sm:$0xff]   ;;  %v1508_v6 = vld [vmem:[%s1931_s1 + $0x28] sm:$0xff]  }
   0x3   :  { %1160 = vmatpush3.bf16.msra.mxu0 %v1503_v0  ;;  %1175 = vmatprep.mubr.bf16.mxu0 %v1611_v4  ;;  %v1507_v5 = vld [vmem:[%s1931_s1 + $0x20] sm:$0xff]   ;;  %v256_v8 = vld [vmem:[%s1933_s2 + $0x8] sm:$0xff]  ;;  %v257_v9 = vld [vmem:[%s1933_s2 + $0x10] sm:$0xff] }
   0x4   :  { %1161 = vmatprep.subr.bf16.mxu0 %v1504_v1  ;;  %v255_v7 = vld [vmem:[%s1933_s2] sm:$0xff]  ;;  %v258_v11 = vld [vmem:[%s1933_s2 + $0x18] sm:$0xff]  ;;  %v260_v14 = vld [vmem:[%s1933_s2 + $0x28] sm:$0xff] }
   0x5   :  { %v1391_v10 = vpack.c.bf16 %v256_v8, %v255_v7  ;;  %v1395_v12 = vpack.c.bf16 %v258_v11, %v257_v9  ;;  %v259_v13 = vld [vmem:[%s1933_s2 + $0x20] sm:$0xff]  ;;  %v1509_v15 = vld [vmem:[%s1931_s1 + $0x30] sm:$0xff]   ;;  %v262_v18 = vld [vmem:[%s1933_s2 + $0x38] sm:$0xff] }
   0x6   :  { %v1399_v16 = vpack.c.bf16 %v260_v14, %v259_v13  ;;  %v261_v17 = vld [vmem:[%s1933_s2 + $0x30] sm:$0xff]  ;;  %v1510_v19 = vld [vmem:[%s1931_s1 + $0x38] sm:$0xff]   ;;  %v263_v21 = vld [vmem:[%s1933_s2 + $0x40] sm:$0xff] }
   0x7   :  { %1162 = vmatpush3.bf16.msra.mxu0 %v1504_v1  ;;  %1392 = vmatprep.subr.bf16.mxu1 %v1391_v10  ;;  %v1403_v20 = vpack.c.bf16 %v262_v18, %v261_v17  ;;  %v264_v22 = vld [vmem:[%s1933_s2 + $0x48] sm:$0xff]  ;;  %v265_v25 = vld [vmem:[%s1933_s2 + $0x50] sm:$0xff]  ;;  %v266_v26 = vld [vmem:[%s1933_s2 + $0x58] sm:$0xff] }
   0x8   :  { %1163 = vmatprep.subr.bf16.mxu0 %v1505_v2  ;;  %1394 = vmatpush3.bf16.msra.mxu1 %v1391_v10  ;;  %v1407_v23 = vpack.c.bf16 %v264_v22, %v263_v21  ;;  %v1659_v24 = vld [vmem:[%s1932_s0 + $0x8] sm:$0xff]   ;;  %v1670_v27 = vld [vmem:[%s1932_s0 + $0x10] sm:$0xff]   ;;  %v1411_v28 = vpack.c.bf16 %v266_v26, %v265_v25  ;;  %v267_v29 = vld [vmem:[%s1933_s2 + $0x60] sm:$0xff] }
   0x9   :  { %1396 = vmatprep.subr.bf16.mxu1 %v1395_v12  ;;  %v268_v30 = vld [vmem:[%s1933_s2 + $0x68] sm:$0xff]  ;;  %v1683_v32 = vld [vmem:[%s1932_s0 + $0x18] sm:$0xff]   ;;  %v1688_v33 = vld [vmem:[%s1932_s0 + $0x20] sm:$0xff]  }
   0xa   :  { %v1415_v31 = vpack.c.bf16 %v268_v30, %v267_v29  ;;  %v1695_v34 = vld [vmem:[%s1932_s0 + $0x28] sm:$0xff]   ;;  %v1700_v35 = vld [vmem:[%s1932_s0 + $0x30] sm:$0xff]   ;;  %v1707_v36 = vld [vmem:[%s1932_s0 + $0x38] sm:$0xff]  }
   0xb   :  { %1164 = vmatpush3.bf16.msra.mxu0 %v1505_v2  ;;  %v269_v37 = vld [vmem:[%s1933_s2 + $0x70] sm:$0xff]  ;;  %v270_v38 = vld [vmem:[%s1933_s2 + $0x78] sm:$0xff]  ;;  %v544_v56 = vld [vmem:[%s1934_s4] sm:$0xff] }
   0xc   :  { %1165 = vmatprep.subr.bf16.mxu0 %v1506_v3  ;;  %1398 = vmatpush3.bf16.msra.mxu1 %v1395_v12  ;;  %v1419_v39 = vpack.c.bf16 %v270_v38, %v269_v37  ;;  %v545_v57 = vld [vmem:[%s1934_s4 + $0x8] sm:$0xff]  ;;  %v546_v58 = vld [vmem:[%s1934_s4 + $0x10] sm:$0xff]  ;;  %v547_v60 = vld [vmem:[%s1934_s4 + $0x18] sm:$0xff] }
   0xd   :  { %1400 = vmatprep.subr.bf16.mxu1 %v1399_v16  ;;  %v1423_v59 = vpack.c.bf16 %v545_v57, %v544_v56  ;;  %v1427_v61 = vpack.c.bf16 %v547_v60, %v546_v58  ;;  %v548_v62 = vld [vmem:[%s1934_s4 + $0x20] sm:$0xff]  ;;  %v549_v63 = vld [vmem:[%s1934_s4 + $0x28] sm:$0xff]  ;;  %v550_v1 = vld [vmem:[%s1934_s4 + $0x30] sm:$0xff] }
   0xe   :  { %v1431_v0 = vpack.c.bf16 %v549_v63, %v548_v62  ;;  %v551_v2 = vld [vmem:[%s1934_s4 + $0x38] sm:$0xff]  ;;  %v554_v7 = vld [vmem:[%s1934_s4 + $0x50] sm:$0xff]  ;;  %v556_v10 = vld [vmem:[%s1934_s4 + $0x60] sm:$0xff] }
   0xf   :  { %1166 = vmatpush3.bf16.msra.mxu0 %v1506_v3  ;;  %v1435_v3 = vpack.c.bf16 %v551_v2, %v550_v1  ;;  %v555_v8 = vld [vmem:[%s1934_s4 + $0x58] sm:$0xff]  ;;  %v557_v11 = vld [vmem:[%s1934_s4 + $0x68] sm:$0xff]  ;;  %v1762_v13 = vld [vmem:[%s1935_s3] ss:$0 sm:$0xff] }
  0x10   :  { %1167 = vmatprep.subr.bf16.mxu0 %v1507_v5  ;;  %1402 = vmatpush3.bf16.msra.mxu1 %v1399_v16  ;;  %v1443_v9 = vpack.c.bf16 %v555_v8, %v554_v7  ;;  %v1447_v12 = vpack.c.bf16 %v557_v11, %v556_v10 }
  0x11   :  { %1404 = vmatprep.subr.bf16.mxu1 %v1403_v20 }
  0x13   :  { %1168 = vmatpush3.bf16.msra.mxu0 %v1507_v5  ;;  %v553_v5 = vld [vmem:[%s1934_s4 + $0x48] sm:$0xff] }
  0x14   :  { %1169 = vmatprep.subr.bf16.mxu0 %v1508_v6  ;;  %1406 = vmatpush3.bf16.msra.mxu1 %v1403_v20 }
  0x15   :  { %1408 = vmatprep.subr.bf16.mxu1 %v1407_v23 }
  0x17   :  { %1170 = vmatpush3.bf16.msra.mxu0 %v1508_v6 }
  0x18   :  { %1171 = vmatprep.subr.bf16.mxu0 %v1509_v15  ;;  %1410 = vmatpush3.bf16.msra.mxu1 %v1407_v23 }
  0x19   :  { %1412 = vmatprep.subr.bf16.mxu1 %v1411_v28 }
  0x1b   :  { %1172 = vmatpush3.bf16.msra.mxu0 %v1509_v15 }
  0x1c   :  { %1173 = vmatprep.subr.bf16.mxu0 %v1510_v19  ;;  %1414 = vmatpush3.bf16.msra.mxu1 %v1411_v28 }
  0x1d   :  { %1416 = vmatprep.subr.bf16.mxu1 %v1415_v31 }
  0x1f   :  { %1174 = vmatpush3.bf16.msra.mxu0 %v1510_v19 }
  0x20   :  { %1418 = vmatpush3.bf16.msra.mxu1 %v1415_v31 }
  0x21   :  { %1420 = vmatprep.subr.bf16.mxu1 %v1419_v39 }
  0x22   :  { %1176 = vmatmul.mubr.bf16.vlgmr.msra.gmra.mrb[0].mxu0 %v1659_v24 }
  0x23   :  { %1179 = vmatprep.mubr.bf16.mxu0 %v1670_v27 }
  0x24   :  { %1422 = vmatpush3.bf16.msra.mxu1 %v1419_v39 }
  0x25   :  { %1424 = vmatprep.subr.bf16.mxu1 %v1423_v59 }
  0x2a   :  { %1180 = vmatmul.mubr.bf16.gmra.mrb[4].mxu0 %v1683_v32 }
  0x2b   :  { %1183 = vmatprep.mubr.bf16.mxu0 %v1688_v33 }
  0x32   :  { %1184 = vmatmul.mubr.bf16.gmra.mrb[8].mxu0 %v1695_v34 }
  0x33   :  { %1187 = vmatprep.mubr.bf16.mxu0 %v1700_v35 }
  0x3a   :  { %1188 = vmatmul.mubr.bf16.gmra.mrb[12].mxu0 %v1707_v36 }
  0x3b   :  { %1263 = vmatprep.mubr.bf16.mxu0 %v1611_v4  ;;  %v552_v4 = vld [vmem:[%s1934_s4 + $0x40] sm:$0xff] }
  0x3c   :  { %v1439_v6 = vpack.c.bf16 %v553_v5, %v552_v4 }
  0xf5   :  { %v1177_v40 = vpop.f32.mrb[0].mxu0 }
  0xf6   :  { %v192_v41 = vpop.f32.mrb[1].mxu0 }
  0xf7   :  { %v1178_v42 = vpop.f32.mrb[2].mxu0  ;;  %1223 = vmatprep.mubr.f32.mxu1 %v192_v41 }
  0xf8   :  { %v195_v43 = vpop.f32.mrb[3].mxu0 }
  0xf9   :  { %1224 = vmatmul.mubr.f32.vlgmr.msra.gmra.mrb[0].mxu1 %v195_v43 }
  0xfa   :  { %1226 = vmatprep.mubr.f32.mxu1 %v1177_v40  ;;  %1426 = vmatpush3.bf16.msra.mxu1 %v1423_v59 }
  0xfb   :  { %1428 = vmatprep.subr.bf16.mxu1 %v1427_v61 }
  0xfd   :  { %v1181_v44 = vpop.f32.mrb[4].mxu0  ;;  %1227 = vmatmul.mubr.f32.gmra.mrb[2].mxu1 %v1178_v42 }
  0xfe   :  { %v208_v45 = vpop.f32.mrb[5].mxu0  ;;  %1430 = vmatpush3.bf16.msra.mxu1 %v1427_v61 }
  0xff   :  { %v1182_v46 = vpop.f32.mrb[6].mxu0  ;;  %1229 = vmatprep.mubr.f32.mxu1 %v208_v45  ;;  %1432 = vmatprep.subr.bf16.mxu1 %v1431_v0 }
 0x100   :  { %v211_v47 = vpop.f32.mrb[7].mxu0 }
 0x101   :  { %1230 = vmatmul.mubr.f32.gmra.mrb[4].mxu1 %v211_v47 }
 0x102   :  { %1232 = vmatprep.mubr.f32.mxu1 %v1181_v44  ;;  %1434 = vmatpush3.bf16.msra.mxu1 %v1431_v0 }
 0x103   :  { %1436 = vmatprep.subr.bf16.mxu1 %v1435_v3 }
 0x105   :  { %v1185_v48 = vpop.f32.mrb[8].mxu0  ;;  %1233 = vmatmul.mubr.f32.gmra.mrb[6].mxu1 %v1182_v46 }
 0x106   :  { %v224_v49 = vpop.f32.mrb[9].mxu0  ;;  %1438 = vmatpush3.bf16.msra.mxu1 %v1435_v3 }
 0x107   :  { %v1186_v50 = vpop.f32.mrb[10].mxu0  ;;  %1235 = vmatprep.mubr.f32.mxu1 %v224_v49  ;;  %1440 = vmatprep.subr.bf16.mxu1 %v1439_v6 }
 0x108   :  { %v227_v51 = vpop.f32.mrb[11].mxu0 }
 0x109   :  { %1236 = vmatmul.mubr.f32.gmra.mrb[8].mxu1 %v227_v51 }
 0x10a   :  { %1238 = vmatprep.mubr.f32.mxu1 %v1185_v48  ;;  %1442 = vmatpush3.bf16.msra.mxu1 %v1439_v6 }
 0x10b   :  { %1444 = vmatprep.subr.bf16.mxu1 %v1443_v9 }
 0x10d   :  { %v1189_v52 = vpop.f32.mrb[12].mxu0  ;;  %1239 = vmatmul.mubr.f32.gmra.mrb[10].mxu1 %v1186_v50 }
 0x10e   :  { %v240_v53 = vpop.f32.mrb[13].mxu0  ;;  %1446 = vmatpush3.bf16.msra.mxu1 %v1443_v9 }
 0x10f   :  { %v1190_v54 = vpop.f32.mrb[14].mxu0  ;;  %1241 = vmatprep.mubr.f32.mxu1 %v240_v53  ;;  %1448 = vmatprep.subr.bf16.mxu1 %v1447_v12 }
 0x110   :  { %v243_v55 = vpop.f32.mrb[15].mxu0 }
 0x111   :  { %1242 = vmatmul.mubr.f32.gmra.mrb[12].mxu1 %v243_v55 }
 0x112   :  { %1244 = vmatprep.mubr.f32.mxu1 %v1189_v52  ;;  %1450 = vmatpush3.bf16.msra.mxu1 %v1447_v12 }
 0x115   :  { %1245 = vmatmul.mubr.f32.gmra.mrb[14].mxu1 %v1190_v54 }
 0x1cc   :  { %v1225_v14 = vpop.f32.mrb[0].mxu1 }
 0x1cd   :  { %v350_v15 = vadd.f32 %v1225_v14, %v1762_v13  ;;  %v344_v16 = vpop.f32.mrb[1].mxu1 }
 0x1ce   :  { %v345_v17 = vadd.f32 %v1762_v13, %v344_v16  ;;  %v717_v16 = vld [vmem:[%s1936_s6 + $0x28] sm:$0xff] }
 0x1cf   :  { %v424_v18 = vmax.f32 %v350_v15, 0.0  ;;  %v716_v15 = vld [vmem:[%s1936_s6 + $0x20] sm:$0xff] }
 0x1d0   :  { %v423_v19 = vmax.f32 %v345_v17, 0.0  ;;  %v1228_v20 = vpop.f32.mrb[2].mxu1  ;;  %v1463_v17 = vpack.c.bf16 %v717_v16, %v716_v15 }
 0x1d1   :  { %v360_v21 = vadd.f32 %v1228_v20, %v1762_v13  ;;  %v354_v22 = vpop.f32.mrb[3].mxu1 }
 0x1d2   :  { %v439_v23 = vpack.c.bf16 %v424_v18, %v423_v19  ;;  %v355_v25 = vadd.f32 %v1762_v13, %v354_v22  ;;  %v718_v18 = vld [vmem:[%s1936_s6 + $0x30] sm:$0xff]  ;;  %v719_v19 = vld [vmem:[%s1936_s6 + $0x38] sm:$0xff]  ;;  %v721_v22 = vld [vmem:[%s1936_s6 + $0x48] sm:$0xff] }
 0x1d3   :  { %v426_v26 = vmax.f32 %v360_v21, 0.0  ;;  %v1467_v20 = vpack.c.bf16 %v719_v19, %v718_v18  ;;  %v720_v21 = vld [vmem:[%s1936_s6 + $0x40] sm:$0xff] }
 0x1d4   :  { %v425_v28 = vmax.f32 %v355_v25, 0.0  ;;  %v1231_v29 = vpop.f32.mrb[4].mxu1  ;;  %1247 = vmatprep.subr.bf16.mxu0 %v439_v23  ;;  %v722_v25 = vld [vmem:[%s1936_s6 + $0x50] sm:$0xff] }
 0x1d5   :  { %v370_v30 = vadd.f32 %v1231_v29, %v1762_v13  ;;  %v364_v31 = vpop.f32.mrb[5].mxu1  ;;  %1248 = vmatpush3.bf16.msra.mxu0 %v439_v23  ;;  %v1471_v23 = vpack.c.bf16 %v721_v22, %v720_v21  ;;  %v724_v29 = vld [vmem:[%s1936_s6 + $0x60] sm:$0xff] }
 0x1d6   :  { %v440_v37 = vpack.c.bf16 %v426_v26, %v425_v28  ;;  %v365_v38 = vadd.f32 %v1762_v13, %v364_v31  ;;  %v723_v26 = vld [vmem:[%s1936_s6 + $0x58] sm:$0xff] }
 0x1d7   :  { %v428_v39 = vmax.f32 %v370_v30, 0.0  ;;  %v1475_v28 = vpack.c.bf16 %v723_v26, %v722_v25  ;;  %v725_v30 = vld [vmem:[%s1936_s6 + $0x68] sm:$0xff] }
 0x1d8   :  { %v427_v40 = vmax.f32 %v365_v38, 0.0  ;;  %v1234_v41 = vpop.f32.mrb[6].mxu1  ;;  %1249 = vmatprep.subr.bf16.mxu0 %v440_v37  ;;  %v1479_v31 = vpack.c.bf16 %v725_v30, %v724_v29 }
 0x1d9   :  { %v380_v42 = vadd.f32 %v1234_v41, %v1762_v13  ;;  %v374_v43 = vpop.f32.mrb[7].mxu1  ;;  %1250 = vmatpush3.bf16.msra.mxu0 %v440_v37 }
 0x1da   :  { %v441_v44 = vpack.c.bf16 %v428_v39, %v427_v40  ;;  %v375_v45 = vadd.f32 %v1762_v13, %v374_v43 }
 0x1db   :  { %v430_v46 = vmax.f32 %v380_v42, 0.0 }
 0x1dc   :  { %v429_v47 = vmax.f32 %v375_v45, 0.0  ;;  %v1237_v48 = vpop.f32.mrb[8].mxu1  ;;  %1251 = vmatprep.subr.bf16.mxu0 %v441_v44 }
 0x1dd   :  { %v390_v49 = vadd.f32 %v1237_v48, %v1762_v13  ;;  %v384_v50 = vpop.f32.mrb[9].mxu1  ;;  %1252 = vmatpush3.bf16.msra.mxu0 %v441_v44 }
 0x1de   :  { %v442_v51 = vpack.c.bf16 %v430_v46, %v429_v47  ;;  %v385_v52 = vadd.f32 %v1762_v13, %v384_v50 }
 0x1df   :  { %v432_v53 = vmax.f32 %v390_v49, 0.0 }
 0x1e0   :  { %v431_v54 = vmax.f32 %v385_v52, 0.0  ;;  %v1240_v55 = vpop.f32.mrb[10].mxu1  ;;  %1253 = vmatprep.subr.bf16.mxu0 %v442_v51 }
 0x1e1   :  { %v400_v56 = vadd.f32 %v1240_v55, %v1762_v13  ;;  %v394_v57 = vpop.f32.mrb[11].mxu1  ;;  %1254 = vmatpush3.bf16.msra.mxu0 %v442_v51 }
 0x1e2   :  { %v443_v58 = vpack.c.bf16 %v432_v53, %v431_v54  ;;  %v395_v59 = vadd.f32 %v1762_v13, %v394_v57  ;;  %v726_v53 = vld [vmem:[%s1936_s6 + $0x70] sm:$0xff]  ;;  %v727_v54 = vld [vmem:[%s1936_s6 + $0x78] sm:$0xff] }
 0x1e3   :  { %v434_v60 = vmax.f32 %v400_v56, 0.0  ;;  %v1483_v55 = vpack.c.bf16 %v727_v54, %v726_v53  ;;  %v1844_v56 = vld [vmem:[%s1937_s5] ss:$0 sm:$0xff] }
 0x1e4   :  { %v433_v61 = vmax.f32 %v395_v59, 0.0  ;;  %v1243_v62 = vpop.f32.mrb[12].mxu1  ;;  %1255 = vmatprep.subr.bf16.mxu0 %v443_v58 }
 0x1e5   :  { %v410_v63 = vadd.f32 %v1243_v62, %v1762_v13  ;;  %v404_v0 = vpop.f32.mrb[13].mxu1  ;;  %1256 = vmatpush3.bf16.msra.mxu0 %v443_v58 }
 0x1e6   :  { %v444_v1 = vpack.c.bf16 %v434_v60, %v433_v61  ;;  %v405_v2 = vadd.f32 %v1762_v13, %v404_v0 }
 0x1e7   :  { %v436_v3 = vmax.f32 %v410_v63, 0.0 }
 0x1e8   :  { %v435_v4 = vmax.f32 %v405_v2, 0.0  ;;  %v1246_v5 = vpop.f32.mrb[14].mxu1  ;;  %1257 = vmatprep.subr.bf16.mxu0 %v444_v1 }
 0x1e9   :  { %v420_v6 = vadd.f32 %v1246_v5, %v1762_v13  ;;  %v414_v7 = vpop.f32.mrb[15].mxu1  ;;  %1258 = vmatpush3.bf16.msra.mxu0 %v444_v1 }
 0x1ea   :  { %v445_v8 = vpack.c.bf16 %v436_v3, %v435_v4  ;;  %v415_v9 = vadd.f32 %v1762_v13, %v414_v7  ;;  %v558_v13 = vld [vmem:[%s1934_s4 + $0x70] sm:$0xff] }
 0x1eb   :  { %v438_v10 = vmax.f32 %v420_v6, 0.0 }
 0x1ec   :  { %v437_v11 = vmax.f32 %v415_v9, 0.0  ;;  %1259 = vmatprep.subr.bf16.mxu0 %v445_v8 }
 0x1ed   :  { %1260 = vmatpush3.bf16.msra.mxu0 %v445_v8 }
 0x1ee   :  { %v446_v12 = vpack.c.bf16 %v438_v10, %v437_v11 }
 0x1f0   :  { %1261 = vmatprep.subr.bf16.mxu0 %v446_v12 }
 0x1f1   :  { %1262 = vmatpush3.bf16.msra.mxu0 %v446_v12 }
 0x1f4   :  { %1264 = vmatmul.mubr.bf16.vlgmr.msra.gmra.mrb[16].mxu0 %v1659_v24  ;;  %v559_v24 = vld [vmem:[%s1934_s4 + $0x78] sm:$0xff] }
 0x1f5   :  { %1267 = vmatprep.mubr.bf16.mxu0 %v1670_v27  ;;  %v1451_v14 = vpack.c.bf16 %v559_v24, %v558_v13  ;;  %v712_v27 = vld [vmem:[%s1936_s6] sm:$0xff] }
 0x1f7   :  { %1452 = vmatprep.subr.bf16.mxu1 %v1451_v14 }
 0x1f8   :  { %1454 = vmatpush3.bf16.msra.mxu1 %v1451_v14 }
 0x1fc   :  { %1268 = vmatmul.mubr.bf16.gmra.mrb[20].mxu0 %v1683_v32  ;;  %v713_v32 = vld [vmem:[%s1936_s6 + $0x8] sm:$0xff] }
 0x1fd   :  { %1271 = vmatprep.mubr.bf16.mxu0 %v1688_v33  ;;  %v714_v33 = vld [vmem:[%s1936_s6 + $0x10] sm:$0xff] }
 0x204   :  { %1272 = vmatmul.mubr.bf16.gmra.mrb[24].mxu0 %v1695_v34  ;;  %v1455_v34 = vpack.c.bf16 %v713_v32, %v712_v27 }
 0x205   :  { %1275 = vmatprep.mubr.bf16.mxu0 %v1700_v35  ;;  %v715_v35 = vld [vmem:[%s1936_s6 + $0x18] sm:$0xff] }
 0x206   :  { %1456 = vmatprep.subr.bf16.mxu0 %v1455_v34  ;;  %1487 = vmatprep.subr.bf16.mxu1 %v1455_v34 }
 0x207   :  { %1458 = vmatpush3.bf16.msra.mxu0 %v1455_v34 }
 0x20c   :  { %1276 = vmatmul.mubr.bf16.gmra.mrb[28].mxu0 %v1707_v36  ;;  %v1459_v36 = vpack.c.bf16 %v715_v35, %v714_v33 }
 0x20e   :  { %1460 = vmatprep.subr.bf16.mxu0 %v1459_v36 }
 0x20f   :  { %1462 = vmatpush3.bf16.msra.mxu0 %v1459_v36 }
 0x210   :  { %1464 = vmatprep.subr.bf16.mxu0 %v1463_v17 }
 0x213   :  { %1466 = vmatpush3.bf16.msra.mxu0 %v1463_v17 }
 0x214   :  { %1468 = vmatprep.subr.bf16.mxu0 %v1467_v20 }
 0x217   :  { %1470 = vmatpush3.bf16.msra.mxu0 %v1467_v20 }
 0x218   :  { %1472 = vmatprep.subr.bf16.mxu0 %v1471_v23 }
 0x21b   :  { %1474 = vmatpush3.bf16.msra.mxu0 %v1471_v23 }
 0x21c   :  { %1476 = vmatprep.subr.bf16.mxu0 %v1475_v28 }
 0x21f   :  { %1478 = vmatpush3.bf16.msra.mxu0 %v1475_v28 }
 0x220   :  { %1480 = vmatprep.subr.bf16.mxu0 %v1479_v31 }
 0x223   :  { %1482 = vmatpush3.bf16.msra.mxu0 %v1479_v31 }
 0x224   :  { %1484 = vmatprep.subr.bf16.mxu0 %v1483_v55 }
 0x227   :  { %1486 = vmatpush3.bf16.msra.mxu0 %v1483_v55 }
 0x2c7   :  { %v1265_v37 = vpop.f32.mrb[16].mxu0 }
 0x2c8   :  { %v481_v38 = vpop.f32.mrb[17].mxu0 }
 0x2c9   :  { %v1266_v39 = vpop.f32.mrb[18].mxu0  ;;  %1311 = vmatprep.mubr.f32.mxu1 %v481_v38 }
 0x2ca   :  { %v484_v40 = vpop.f32.mrb[19].mxu0 }
 0x2cb   :  { %1312 = vmatmul.mubr.f32.vlgmr.msra.gmra.mrb[16].mxu1 %v484_v40 }
 0x2cc   :  { %1314 = vmatprep.mubr.f32.mxu1 %v1265_v37  ;;  %1495 = vmatpush3.bf16.msra.mxu1 %v1455_v34 }
 0x2cd   :  { %1488 = vmatprep.subr.bf16.mxu1 %v1459_v36 }
 0x2cf   :  { %v1269_v41 = vpop.f32.mrb[20].mxu0  ;;  %1315 = vmatmul.mubr.f32.gmra.mrb[18].mxu1 %v1266_v39 }
 0x2d0   :  { %v497_v42 = vpop.f32.mrb[21].mxu0  ;;  %1496 = vmatpush3.bf16.msra.mxu1 %v1459_v36 }
 0x2d1   :  { %v1270_v43 = vpop.f32.mrb[22].mxu0  ;;  %1317 = vmatprep.mubr.f32.mxu1 %v497_v42  ;;  %1489 = vmatprep.subr.bf16.mxu1 %v1463_v17 }
 0x2d2   :  { %v500_v44 = vpop.f32.mrb[23].mxu0 }
 0x2d3   :  { %1318 = vmatmul.mubr.f32.gmra.mrb[20].mxu1 %v500_v44 }
 0x2d4   :  { %1320 = vmatprep.mubr.f32.mxu1 %v1269_v41  ;;  %1497 = vmatpush3.bf16.msra.mxu1 %v1463_v17 }
 0x2d5   :  { %1490 = vmatprep.subr.bf16.mxu1 %v1467_v20 }
 0x2d7   :  { %v1273_v45 = vpop.f32.mrb[24].mxu0  ;;  %1321 = vmatmul.mubr.f32.gmra.mrb[22].mxu1 %v1270_v43 }
 0x2d8   :  { %v513_v46 = vpop.f32.mrb[25].mxu0  ;;  %1498 = vmatpush3.bf16.msra.mxu1 %v1467_v20 }
 0x2d9   :  { %v1274_v47 = vpop.f32.mrb[26].mxu0  ;;  %1323 = vmatprep.mubr.f32.mxu1 %v513_v46  ;;  %1491 = vmatprep.subr.bf16.mxu1 %v1471_v23 }
 0x2da   :  { %v516_v48 = vpop.f32.mrb[27].mxu0 }
 0x2db   :  { %1324 = vmatmul.mubr.f32.gmra.mrb[24].mxu1 %v516_v48 }
 0x2dc   :  { %1326 = vmatprep.mubr.f32.mxu1 %v1273_v45  ;;  %1499 = vmatpush3.bf16.msra.mxu1 %v1471_v23 }
 0x2dd   :  { %1492 = vmatprep.subr.bf16.mxu1 %v1475_v28 }
 0x2df   :  { %v1277_v49 = vpop.f32.mrb[28].mxu0  ;;  %1327 = vmatmul.mubr.f32.gmra.mrb[26].mxu1 %v1274_v47 }
 0x2e0   :  { %v529_v50 = vpop.f32.mrb[29].mxu0  ;;  %1500 = vmatpush3.bf16.msra.mxu1 %v1475_v28 }
 0x2e1   :  { %v1278_v51 = vpop.f32.mrb[30].mxu0  ;;  %1329 = vmatprep.mubr.f32.mxu1 %v529_v50  ;;  %1493 = vmatprep.subr.bf16.mxu1 %v1479_v31 }
 0x2e2   :  { %v532_v52 = vpop.f32.mrb[31].mxu0 }
 0x2e3   :  { %1330 = vmatmul.mubr.f32.gmra.mrb[28].mxu1 %v532_v52 }
 0x2e4   :  { %1332 = vmatprep.mubr.f32.mxu1 %v1277_v49  ;;  %1501 = vmatpush3.bf16.msra.mxu1 %v1479_v31 }
 0x2e5   :  { %1494 = vmatprep.subr.bf16.mxu1 %v1483_v55 }
 0x2e7   :  { %1333 = vmatmul.mubr.f32.gmra.mrb[30].mxu1 %v1278_v51 }
 0x2e8   :  { %1502 = vmatpush3.bf16.msra.mxu1 %v1483_v55 }
 0x39e   :  { %v1313_v57 = vpop.f32.mrb[16].mxu1 }
 0x39f   :  { %v639_v58 = vadd.f32 %v1313_v57, %v1844_v56  ;;  %v633_v59 = vpop.f32.mrb[17].mxu1 }
 0x3a0   :  { %v634_v60 = vadd.f32 %v1844_v56, %v633_v59 }
 0x3a1   :  { %v874_v61 = vmul.f32 %v639_v58, %v639_v58 }
 0x3a2   :  { %v1316_v62 = vpop.f32.mrb[18].mxu1  ;;  %1367 = vmatprep.mubr.f32.mxu0 %v634_v60  ;;  %v873_v3 = vmul.f32 %v634_v60, %v634_v60 }
 0x3a3   :  { %v649_v63 = vadd.f32 %v1316_v62, %v1844_v56  ;;  %891 = vadd.xlane.f32.xlu0 %v874_v61  ;;  %v643_v0 = vpop.f32.mrb[19].mxu1  ;;  %1368 = vmatmul.mubr.f32.vlgmr.msra.gmra.mrb[32].mxu0 %v639_v58 }
 0x3a4   :  { %v644_v1 = vadd.f32 %v1844_v56, %v643_v0 }
 0x3a5   :  { %v876_v2 = vmul.f32 %v649_v63, %v649_v63 }
 0x3a6   :  { %v1319_v4 = vpop.f32.mrb[20].mxu1  ;;  %1370 = vmatprep.mubr.f32.mxu0 %v644_v1  ;;  %v875_v8 = vmul.f32 %v644_v1, %v644_v1 }
 0x3a7   :  { %895 = vadd.xlane.f32.xlu1 %v876_v2  ;;  %889 = vadd.xlane.f32.xlu0 %v873_v3  ;;  %v653_v5 = vpop.f32.mrb[21].mxu1  ;;  %v659_v7 = vadd.f32 %v1319_v4, %v1844_v56 }
 0x3a8   :  { %v654_v6 = vadd.f32 %v1844_v56, %v653_v5  ;;  %1371 = vmatmul.mubr.f32.gmra.mrb[34].mxu0 %v649_v63  ;;  %v1865_v63 = vld [vmem:[%s1938_s7] ss:$0 sm:$0xff] }
 0x3a9   :  { %v878_v24 = vmul.f32 %v659_v7, %v659_v7 }
 0x3aa   :  { %v1322_v9 = vpop.f32.mrb[22].mxu1  ;;  %1373 = vmatprep.mubr.f32.mxu0 %v654_v6  ;;  %v877_v10 = vmul.f32 %v654_v6, %v654_v6 }
 0x3ab   :  { %893 = vadd.xlane.f32.xlu1 %v875_v8  ;;  %v663_v11 = vpop.f32.mrb[23].mxu1  ;;  %v669_v13 = vadd.f32 %v1322_v9, %v1844_v56 }
 0x3ac   :  { %v664_v12 = vadd.f32 %v1844_v56, %v663_v11  ;;  %1374 = vmatmul.mubr.f32.gmra.mrb[36].mxu0 %v659_v7  ;;  %897 = vadd.xlane.f32.xlu0 %v877_v10 }
 0x3ad   :  { %v880_v35 = vmul.f32 %v669_v13, %v669_v13 }
 0x3ae   :  { %v1325_v14 = vpop.f32.mrb[24].mxu1  ;;  %1376 = vmatprep.mubr.f32.mxu0 %v664_v12  ;;  %v879_v27 = vmul.f32 %v664_v12, %v664_v12 }
 0x3af   :  { %899 = vadd.xlane.f32.xlu1 %v878_v24  ;;  %v673_v32 = vpop.f32.mrb[25].mxu1  ;;  %v679_v34 = vadd.f32 %v1325_v14, %v1844_v56 }
 0x3b0   :  { %v674_v33 = vadd.f32 %v1844_v56, %v673_v32  ;;  %1377 = vmatmul.mubr.f32.gmra.mrb[38].mxu0 %v669_v13  ;;  %901 = vadd.xlane.f32.xlu0 %v879_v27 }
 0x3b1   :  { %v882_v19 = vmul.f32 %v679_v34, %v679_v34 }
 0x3b2   :  { %v1328_v36 = vpop.f32.mrb[26].mxu1  ;;  %1379 = vmatprep.mubr.f32.mxu1 %v674_v33  ;;  %v881_v15 = vmul.f32 %v674_v33, %v674_v33 }
 0x3b3   :  { %903 = vadd.xlane.f32.xlu1 %v880_v35  ;;  %v683_v16 = vpop.f32.mrb[27].mxu1  ;;  %1380 = vmatmul.mubr.f32.vlgmr.msra.gmra.mrb[32].mxu1 %v679_v34  ;;  %v689_v18 = vadd.f32 %v1328_v36, %v1844_v56 }
 0x3b4   :  { %v684_v17 = vadd.f32 %v1844_v56, %v683_v16  ;;  %905 = vadd.xlane.f32.xlu0 %v881_v15 }
 0x3b5   :  { %v884_v26 = vmul.f32 %v689_v18, %v689_v18 }
 0x3b6   :  { %v1331_v20 = vpop.f32.mrb[28].mxu1  ;;  %1382 = vmatprep.mubr.f32.mxu1 %v684_v17  ;;  %v883_v21 = vmul.f32 %v684_v17, %v684_v17 }
 0x3b7   :  { %907 = vadd.xlane.f32.xlu1 %v882_v19  ;;  %v693_v22 = vpop.f32.mrb[29].mxu1  ;;  %1383 = vmatmul.mubr.f32.gmra.mrb[34].mxu1 %v689_v18  ;;  %v699_v25 = vadd.f32 %v1331_v20, %v1844_v56 }
 0x3b8   :  { %v694_v23 = vadd.f32 %v1844_v56, %v693_v22  ;;  %909 = vadd.xlane.f32.xlu0 %v883_v21 }
 0x3b9   :  { %v886_v38 = vmul.f32 %v699_v25, %v699_v25 }
 0x3ba   :  { %v1334_v28 = vpop.f32.mrb[30].mxu1  ;;  %1385 = vmatprep.mubr.f32.mxu1 %v694_v23  ;;  %v885_v29 = vmul.f32 %v694_v23, %v694_v23 }
 0x3bb   :  { %911 = vadd.xlane.f32.xlu1 %v884_v26  ;;  %v703_v30 = vpop.f32.mrb[31].mxu1  ;;  %1386 = vmatmul.mubr.f32.gmra.mrb[36].mxu1 %v699_v25  ;;  %v709_v37 = vadd.f32 %v1334_v28, %v1844_v56 }
 0x3bc   :  { %v704_v31 = vadd.f32 %v1844_v56, %v703_v30  ;;  %913 = vadd.xlane.f32.xlu0 %v885_v29 }
 0x3bd   :  { %v888_v40 = vmul.f32 %v709_v37, %v709_v37 }
 0x3be   :  { %1388 = vmatprep.mubr.f32.mxu1 %v704_v31  ;;  %v887_v39 = vmul.f32 %v704_v31, %v704_v31 }
 0x3bf   :  { %915 = vadd.xlane.f32.xlu1 %v886_v38  ;;  %1389 = vmatmul.mubr.f32.gmra.mrb[38].mxu1 %v709_v37 }
 0x3c0   :  { %917 = vadd.xlane.f32.xlu0 %v887_v39 }
 0x3c3   :  { %919 = vadd.xlane.f32.xlu1 %v888_v40 }
 0x430   :  { %v892_v42 = vpop.xlane.xlu0 %891 }
 0x431   :  { %v922_v47 = vmax.f32 %v892_v42, 1e-16 }
 0x433   :  { %1519 = vrsqrt.f32 %v922_v47 }
 0x434   :  { %v896_v41 = vpop.xlane.xlu1 %895  ;;  %v890_v44 = vpop.xlane.xlu0 %889 }
 0x435   :  { %v921_v48 = vmax.f32 %v890_v44, 1e-16  ;;  %v924_v51 = vmax.f32 %v896_v41, 1e-16 }
 0x437   :  { %1521 = vrsqrt.f32 %v921_v48 }
 0x438   :  { %v894_v43 = vpop.xlane.xlu1 %893  ;;  %1523 = vrsqrt.f32 %v924_v51 }
 0x439   :  { %v898_v46 = vpop.xlane.xlu0 %897  ;;  %v923_v52 = vmax.f32 %v894_v43, 1e-16 }
 0x43a   :  { %v925_v56 = vmax.f32 %v898_v46, 1e-16 }
 0x43b   :  { %1525 = vrsqrt.f32 %v923_v52 }
 0x43c   :  { %v900_v45 = vpop.xlane.xlu1 %899 }
 0x43d   :  { %v902_v50 = vpop.xlane.xlu0 %901  ;;  %v926_v55 = vmax.f32 %v900_v45, 1e-16  ;;  %v1520_v59 = vpop.eup %1519 }
 0x43e   :  { %v927_v60 = vmax.f32 %v902_v50, 1e-16 }
 0x43f   :  { %1527 = vrsqrt.f32 %v926_v55 }
 0x440   :  { %v904_v49 = vpop.xlane.xlu1 %903  ;;  %1529 = vrsqrt.f32 %v925_v56 }
 0x441   :  { %v906_v54 = vpop.xlane.xlu0 %905  ;;  %v928_v57 = vmax.f32 %v904_v49, 1e-16  ;;  %v1522_v0 = vpop.eup %1521 }
 0x442   :  { %v929_v5 = vmax.f32 %v906_v54, 1e-16  ;;  %v1524_v8 = vpop.eup %1523 }
 0x443   :  { %1531 = vrsqrt.f32 %v928_v57 }
 0x444   :  { %v908_v53 = vpop.xlane.xlu1 %907  ;;  %1533 = vrsqrt.f32 %v927_v60 }
 0x445   :  { %v910_v61 = vpop.xlane.xlu0 %909  ;;  %v930_v3 = vmax.f32 %v908_v53, 1e-16  ;;  %v1526_v11 = vpop.eup %1525 }
 0x446   :  { %v931_v27 = vmax.f32 %v910_v61, 1e-16 }
 0x447   :  { %1535 = vrsqrt.f32 %v930_v3 }
 0x448   :  { %v912_v58 = vpop.xlane.xlu1 %911  ;;  %1537 = vrsqrt.f32 %v929_v5 }
 0x449   :  { %v932_v12 = vmax.f32 %v912_v58, 1e-16  ;;  %v914_v13 = vpop.xlane.xlu0 %913  ;;  %v1528_v34 = vpop.eup %1527 }
 0x44a   :  { %v1530_v15 = vpop.eup %1529  ;;  %v933_v19 = vmax.f32 %v914_v13, 1e-16 }
 0x44b   :  { %1539 = vrsqrt.f32 %v932_v12 }
 0x44c   :  { %v916_v9 = vpop.xlane.xlu1 %915  ;;  %1541 = vrsqrt.f32 %v931_v27 }
 0x44d   :  { %v934_v16 = vmax.f32 %v916_v9, 1e-16  ;;  %v918_v22 = vpop.xlane.xlu0 %917  ;;  %v1532_v25 = vpop.eup %1531 }
 0x44e   :  { %v1534_v29 = vpop.eup %1533  ;;  %v935_v38 = vmax.f32 %v918_v22, 1e-16 }
 0x44f   :  { %1543 = vrsqrt.f32 %v934_v16 }
 0x450   :  { %v920_v20 = vpop.xlane.xlu1 %919  ;;  %1545 = vrsqrt.f32 %v933_v19 }
 0x451   :  { %v936_v30 = vmax.f32 %v920_v20, 1e-16  ;;  %v1536_v40 = vpop.eup %1535 }
 0x452   :  { %v1538_v43 = vpop.eup %1537 }
 0x453   :  { %1547 = vrsqrt.f32 %v936_v30 }
 0x454   :  { %1549 = vrsqrt.f32 %v935_v38 }
 0x455   :  { %v1540_v49 = vpop.eup %1539 }
 0x456   :  { %v1542_v52 = vpop.eup %1541 }
 0x459   :  { %v1544_v57 = vpop.eup %1543 }
 0x45a   :  { %v1546_v60 = vpop.eup %1545 }
 0x476   :  { %v1369_v62 = vpop.f32.mrb[32].mxu0 }
 0x477   :  { %v954_v1 = vmul.f32 %v1520_v59, %v1369_v62  ;;  %v794_v2 = vpop.f32.mrb[33].mxu0 }
 0x478   :  { %v953_v4 = vmul.f32 %v1522_v0, %v794_v2  ;;  %v1548_v2 = vpop.eup %1547 }
 0x479   :  { %v977_v6 = vmul.f32 %v1865_v63, %v954_v1  ;;  %v1550_v5 = vpop.eup %1549 }
 0x47a   :  { %v976_v7 = vmul.f32 %v1865_v63, %v953_v4 }
 0x47b   :  { %993 = vst [vmem:[%s1939_s8 + $0x8] sm:$0xff] %v977_v6  ;;  %v1372_v10 = vpop.f32.mrb[34].mxu0 }
 0x47c   :  { %992 = vst [vmem:[%s1939_s8] sm:$0xff] %v976_v7  ;;  %v956_v24 = vmul.f32 %v1524_v8, %v1372_v10  ;;  %v804_v14 = vpop.f32.mrb[35].mxu0 }
 0x47d   :  { %v955_v32 = vmul.f32 %v1526_v11, %v804_v14 }
 0x47e   :  { %v979_v33 = vmul.f32 %v1865_v63, %v956_v24 }
 0x47f   :  { %v978_v35 = vmul.f32 %v1865_v63, %v955_v32  ;;  %v1375_v36 = vpop.f32.mrb[36].mxu0 }
 0x480   :  { %995 = vst [vmem:[%s1939_s8 + $0x18] sm:$0xff] %v979_v33  ;;  %v958_v17 = vmul.f32 %v1528_v34, %v1375_v36  ;;  %v814_v18 = vpop.f32.mrb[37].mxu0 }
 0x481   :  { %994 = vst [vmem:[%s1939_s8 + $0x10] sm:$0xff] %v978_v35  ;;  %v957_v21 = vmul.f32 %v1530_v15, %v814_v18 }
 0x482   :  { %v981_v23 = vmul.f32 %v1865_v63, %v958_v17 }
 0x483   :  { %v980_v26 = vmul.f32 %v1865_v63, %v957_v21  ;;  %v1378_v28 = vpop.f32.mrb[38].mxu0 }
 0x484   :  { %997 = vst [vmem:[%s1939_s8 + $0x28] sm:$0xff] %v981_v23  ;;  %v960_v31 = vmul.f32 %v1532_v25, %v1378_v28  ;;  %v824_v37 = vpop.f32.mrb[39].mxu0 }
 0x485   :  { %996 = vst [vmem:[%s1939_s8 + $0x20] sm:$0xff] %v980_v26  ;;  %v959_v39 = vmul.f32 %v1534_v29, %v824_v37 }
 0x486   :  { %v983_v41 = vmul.f32 %v1865_v63, %v960_v31  ;;  %v1381_v42 = vpop.f32.mrb[32].mxu1 }
 0x487   :  { %v982_v44 = vmul.f32 %v1865_v63, %v959_v39  ;;  %v962_v45 = vmul.f32 %v1536_v40, %v1381_v42  ;;  %v834_v46 = vpop.f32.mrb[33].mxu1 }
 0x488   :  { %999 = vst [vmem:[%s1939_s8 + $0x38] sm:$0xff] %v983_v41  ;;  %v961_v47 = vmul.f32 %v1538_v43, %v834_v46 }
 0x489   :  { %998 = vst [vmem:[%s1939_s8 + $0x30] sm:$0xff] %v982_v44  ;;  %v985_v48 = vmul.f32 %v1865_v63, %v962_v45 }
 0x48a   :  { %v984_v50 = vmul.f32 %v1865_v63, %v961_v47  ;;  %v1384_v51 = vpop.f32.mrb[34].mxu1 }
 0x48b   :  { %1001 = vst [vmem:[%s1939_s8 + $0x48] sm:$0xff] %v985_v48  ;;  %v964_v53 = vmul.f32 %v1540_v49, %v1384_v51  ;;  %v844_v54 = vpop.f32.mrb[35].mxu1 }
 0x48c   :  { %1000 = vst [vmem:[%s1939_s8 + $0x40] sm:$0xff] %v984_v50  ;;  %v963_v55 = vmul.f32 %v1542_v52, %v844_v54 }
 0x48d   :  { %v987_v56 = vmul.f32 %v1865_v63, %v964_v53 }
 0x48e   :  { %v986_v58 = vmul.f32 %v1865_v63, %v963_v55  ;;  %v1387_v59 = vpop.f32.mrb[36].mxu1 }
 0x48f   :  { %1003 = vst [vmem:[%s1939_s8 + $0x58] sm:$0xff] %v987_v56  ;;  %v966_v61 = vmul.f32 %v1544_v57, %v1387_v59  ;;  %v854_v62 = vpop.f32.mrb[37].mxu1 }
 0x490   :  { %1002 = vst [vmem:[%s1939_s8 + $0x50] sm:$0xff] %v986_v58  ;;  %v965_v0 = vmul.f32 %v1546_v60, %v854_v62 }
 0x491   :  { %v989_v1 = vmul.f32 %v1865_v63, %v966_v61 }
 0x492   :  { %v988_v3 = vmul.f32 %v1865_v63, %v965_v0  ;;  %v1390_v4 = vpop.f32.mrb[38].mxu1 }
 0x493   :  { %1005 = vst [vmem:[%s1939_s8 + $0x68] sm:$0xff] %v989_v1  ;;  %v968_v6 = vmul.f32 %v1548_v2, %v1390_v4  ;;  %v864_v7 = vpop.f32.mrb[39].mxu1 }
 0x494   :  { %1004 = vst [vmem:[%s1939_s8 + $0x60] sm:$0xff] %v988_v3  ;;  %v967_v8 = vmul.f32 %v1550_v5, %v864_v7 }
 0x495   :  { %v991_v9 = vmul.f32 %v1865_v63, %v968_v6 }
 0x496   :  { %v990_v10 = vmul.f32 %v1865_v63, %v967_v8 }
 0x497   :  { %1007 = vst [vmem:[%s1939_s8 + $0x78] sm:$0xff] %v991_v9 }
 0x498   :  { %1006 = vst [vmem:[%s1939_s8 + $0x70] sm:$0xff] %v990_v10 }

</bundles_post_ra>
